<compile_context>
chip_gen: v5e
topology: v5e:2x2
jax: 0.10.0
libtpu: 0.0.40
codegen_flags: <defaults>
</compile_context>

<pallas_src>
import functools

import jax
import jax.numpy as jnp
from jax.experimental import pallas as pl
from jax.experimental.pallas import tpu as pltpu


_NEG_FILL = -1e30  # exp(NEG_FILL*inv_t - m) == 0 in f32; no inf/nan corner cases.


def _cdiv(a, b):
    return (a + b - 1) // b


def _round_up(x, m):
    return ((x + m - 1) // m) * m


def _vmem_capacity_bytes():
    try:
        return int(pltpu.get_tpu_info().vmem_capacity_bytes)
    except Exception:
        return 64 * 1024 * 1024  # conservative (v7x-sized) fallback


def _contrastive_loss_kernel(pos_ref, neg_ref, loss_ref, m_acc, s_acc, *,
                             inv_t, k_valid, k_tile, mask_k):
    k = pl.program_id(1)

    # Positive logit: tiny (n_tile, 1) column; kept out of the per-element path.
    pos_logit = pos_ref[...].astype(jnp.float32) * inv_t

    @pl.when(k == 0)
    def _init():
        # logsumexp set starts as {pos/t}: running max = pos/t, running sum = 1.
        m_acc[...] = pos_logit
        s_acc[...] = jnp.ones_like(s_acc)

    d = neg_ref[...].astype(jnp.float32) * inv_t                 # (n_tile, k_tile)
    if mask_k:
        # Ragged-K tail: out-of-bounds lanes contain garbage; mask them BEFORE
        # both the max and the exp.
        col = k * k_tile + jax.lax.broadcasted_iota(jnp.int32, d.shape, 1)
        d = jnp.where(col < k_valid, d, _NEG_FILL)

    m_prev = m_acc[...]
    m_new = jnp.maximum(m_prev, jnp.max(d, axis=1, keepdims=True))
    s_acc[...] = (s_acc[...] * jnp.exp(m_prev - m_new)
                  + jnp.sum(jnp.exp(d - m_new), axis=1, keepdims=True))
    m_acc[...] = m_new

    @pl.when(k == pl.num_programs(1) - 1)
    def _finalize():
        # loss_row = logsumexp(all logits) - pos/t
        loss_ref[...] = m_acc[...] + jnp.log(s_acc[...]) - pos_logit


def contrastive_head_forward(pos, neg, temperature=0.1, *, n_tile=None, k_tile=None):
    """Pallas equivalent of ContrastiveHead.forward.

    Args:
      pos: (N, 1) positive similarities.
      neg: (N, K) negative similarities (any float dtype; bf16 halves HBM traffic).
    Returns:
      dict with 'loss_contra' scalar (float32).
    """
    N, one = pos.shape
    assert one == 1, "pos must be (N, 1)"
    Nn, K = neg.shape
    assert Nn == N

    inv_t = float(1.0 / temperature)
    elem = jnp.dtype(neg.dtype).itemsize

    # Generation-aware VMEM budgeting (128 MiB on v5e/v6e, 64 MiB on v7x).
    vmem_cap = _vmem_capacity_bytes()
    if vmem_cap >= 100 * 1024 * 1024:
        block_budget = 32 * 1024 * 1024   # often fits full-K rows -> 1 reduction step
        vmem_limit = 96 * 1024 * 1024
    else:
        block_budget = 8 * 1024 * 1024    # 2x double-buffered stays well under 64 MiB
        vmem_limit = 48 * 1024 * 1024

    # N tile: <=128, multiple of 8, and >=2 blocks when N > 8 so the "parallel"
    # axis actually shards across both TensorCores on v7x.
    if n_tile is None:
        n_tile = min(128, _round_up(_cdiv(N, 2), 8))
    else:
        n_tile = _round_up(int(n_tile), 8)
    if n_tile >= N:
        n_tile = N  # single N block; block dim == full array dim (always legal)

    # K tile: as large as the VMEM budget allows (HBM-bound kernel); full K when
    # it fits (removes all cross-tile LSE accumulation).  Must be a multiple of
    # 128 whenever it actually tiles K.
    if k_tile is None:
        budget_cols = max(128, block_budget // (max(n_tile, 8) * elem))
        k_tile = K if K <= budget_cols else (budget_cols // 128) * 128
    else:
        k_tile = K if int(k_tile) >= K else int(k_tile)
    if k_tile < K:
        assert k_tile % 128 == 0, "k_tile must be a multiple of 128 when it tiles K"

    n_blocks = _cdiv(N, n_tile)
    k_blocks = _cdiv(K, k_tile)
    mask_k = (K % k_tile) != 0  # ragged K tail handled in-kernel (no HBM pad copy)

    kernel = functools.partial(_contrastive_loss_kernel, inv_t=inv_t,
                               k_valid=K, k_tile=k_tile, mask_k=mask_k)

    per_row_loss = pl.pallas_call(
        kernel,
        out_shape=jax.ShapeDtypeStruct((N, 1), jnp.float32),
        grid_spec=pltpu.PrefetchScalarGridSpec(
            num_scalar_prefetch=0,
            grid=(n_blocks, k_blocks),
            in_specs=[
                pl.BlockSpec((n_tile, 1), lambda i, k: (i, 0)),        # pos
                pl.BlockSpec((n_tile, k_tile), lambda i, k: (i, k)),   # neg (streamed)
            ],
            out_specs=pl.BlockSpec((n_tile, 1), lambda i, k: (i, 0)),
            scratch_shapes=[
                pltpu.VMEM((n_tile, 1), jnp.float32),   # running max
                pltpu.VMEM((n_tile, 1), jnp.float32),   # running sum
            ],
        ),
        compiler_params=pltpu.CompilerParams(
            dimension_semantics=("parallel", "arbitrary"),
            vmem_limit_bytes=vmem_limit,
        ),
        cost_estimate=pl.CostEstimate(
            flops=3 * N * K,
            transcendentals=N * K,
            bytes_accessed=N * K * elem + 2 * N * pos.dtype.itemsize + N * 4,
        ),
    )(pos, neg)

    loss = jnp.mean(per_row_loss[:, 0])
    return {"loss_contra": loss}


def _reference(pos, neg, temperature=0.1):
    logits = jnp.concatenate([pos, neg], axis=1).astype(jnp.float32) / temperature
    m = jnp.max(logits, axis=1, keepdims=True)
    lse = jnp.log(jnp.sum(jnp.exp(logits - m), axis=1)) + m[:, 0]
    return jnp.mean(lse - logits[:, 0])


if __name__ == "__main__":
    key = jax.random.PRNGKey(0)
    temperature = 0.1

    def _check(pos, neg, **kw):
        out = contrastive_head_forward(pos, neg, temperature=temperature, **kw)
        loss = jax.block_until_ready(out["loss_contra"])
        ref = _reference(pos, neg, temperature=temperature)
        assert jnp.allclose(loss, ref, rtol=1e-5, atol=1e-4), (loss, ref)

    k1, k2, k3, k4, k5, k6 = jax.random.split(key, 6)

    # Case 1: aligned shapes, default tiles -> single K step (full-row block).
    _check(jax.random.normal(k1, (16, 1), dtype=jnp.float32),
           jax.random.normal(k2, (16, 384), dtype=jnp.float32))

    # Case 2: forced small k_tile -> multi-step online-LSE accumulation across K.
    _check(jax.random.normal(k3, (16, 1), dtype=jnp.float32),
           jax.random.normal(k4, (16, 512), dtype=jnp.float32), k_tile=128)

    # Case 3: ragged N and K -> in-kernel tail masking + clipped boundary
    # blocks (no wrapper-side padding copy of neg).
    _check(jax.random.normal(k5, (12, 1), dtype=jnp.float32),
           jax.random.normal(k6, (12, 200), dtype=jnp.float32), k_tile=128)

    print("KERNEL_OK")
</pallas_src>

<mosaic_0001>
module attributes {stable_mosaic.version = 11 : i64} {
  func.func @_contrastive_loss_kernel(%arg0: i32, %arg1: i32, %arg2: memref<8x1xf32, #tpu.memory_space<vmem>>, %arg3: memref<8x384xf32, #tpu.memory_space<vmem>>, %arg4: memref<8x1xf32, #tpu.memory_space<vmem>>, %arg5: memref<8x1xf32, #tpu.memory_space<vmem>>, %arg6: memref<8x1xf32, #tpu.memory_space<vmem>>) attributes {dimension_semantics = [#tpu.dimension_semantics<parallel>, #tpu.dimension_semantics<arbitrary>], iteration_bounds = array<i64: 2, 1>, scalar_prefetch = 0 : i64, scratch_operands = 2 : i64, tpu.core_type = #tpu.core_type<tc>, window_params = [{transform_indices = @transform_0, window_bounds = array<i64: 8, 1>}, {transform_indices = @transform_1, window_bounds = array<i64: 8, 384>}, {transform_indices = @transform_2, window_bounds = array<i64: 8, 1>}]} {
    %c0 = arith.constant 0 : index
    %c0_0 = arith.constant 0 : index
    %0 = vector.load %arg2[%c0, %c0_0] : memref<8x1xf32, #tpu.memory_space<vmem>>, vector<8x1xf32>
    %cst = arith.constant 1.000000e+01 : f32
    %1 = vector.broadcast %cst : f32 to vector<8x1xf32>
    %2 = arith.mulf %0, %1 : vector<8x1xf32>
    %c0_i32 = arith.constant 0 : i32
    %3 = arith.cmpi eq, %arg1, %c0_i32 : i32
    %4 = arith.extui %3 : i1 to i32
    %c0_i32_1 = arith.constant 0 : i32
    %5 = arith.cmpi ne, %4, %c0_i32_1 : i32
    scf.if %5 {
      %c0_17 = arith.constant 0 : index
      %c0_18 = arith.constant 0 : index
      %28 = vector.load %arg5[%c0_17, %c0_18] : memref<8x1xf32, #tpu.memory_space<vmem>>, vector<8x1xf32>
      tpu.vector_store %arg5[%c0_17, %c0_18], %2 {strides = array<i32>} : memref<8x1xf32, #tpu.memory_space<vmem>>, vector<8x1xf32>,
      %cst_19 = arith.constant 1.000000e+00 : f32
      %29 = vector.broadcast %cst_19 : f32 to vector<8x1xf32>
      %c0_20 = arith.constant 0 : index
      %c0_21 = arith.constant 0 : index
      %30 = vector.load %arg6[%c0_20, %c0_21] : memref<8x1xf32, #tpu.memory_space<vmem>>, vector<8x1xf32>
      tpu.vector_store %arg6[%c0_20, %c0_21], %29 {strides = array<i32>} : memref<8x1xf32, #tpu.memory_space<vmem>>, vector<8x1xf32>,
    } else {
    }
    %c0_2 = arith.constant 0 : index
    %c0_3 = arith.constant 0 : index
    %6 = vector.load %arg3[%c0_2, %c0_3] : memref<8x384xf32, #tpu.memory_space<vmem>>, vector<8x384xf32>
    %cst_4 = arith.constant 1.000000e+01 : f32
    %7 = vector.broadcast %cst_4 : f32 to vector<8x384xf32>
    %8 = arith.mulf %6, %7 : vector<8x384xf32>
    %c0_5 = arith.constant 0 : index
    %c0_6 = arith.constant 0 : index
    %9 = vector.load %arg5[%c0_5, %c0_6] : memref<8x1xf32, #tpu.memory_space<vmem>>, vector<8x1xf32>
    %cst_7 = arith.constant dense<0xFF800000> : vector<8xf32>
    %10 = vector.multi_reduction <maximumf>, %8, %cst_7 [1] : vector<8x384xf32> to vector<8xf32>
    %11 = vector.shape_cast %10 : vector<8xf32> to vector<8x1xf32>
    %12 = arith.maximumf %9, %11 : vector<8x1xf32>
    %c0_8 = arith.constant 0 : index
    %c0_9 = arith.constant 0 : index
    %13 = vector.load %arg6[%c0_8, %c0_9] : memref<8x1xf32, #tpu.memory_space<vmem>>, vector<8x1xf32>
    %14 = arith.subf %9, %12 : vector<8x1xf32>
    %15 = math.exp %14 : vector<8x1xf32>
    %16 = arith.mulf %13, %15 : vector<8x1xf32>
    %17 = vector.broadcast %12 : vector<8x1xf32> to vector<8x384xf32>
    %18 = arith.subf %8, %17 : vector<8x384xf32>
    %19 = math.exp %18 : vector<8x384xf32>
    %cst_10 = arith.constant dense<0.000000e+00> : vector<8xf32>
    %20 = vector.multi_reduction <add>, %19, %cst_10 [1] : vector<8x384xf32> to vector<8xf32>
    %21 = vector.shape_cast %20 : vector<8xf32> to vector<8x1xf32>
    %22 = arith.addf %16, %21 : vector<8x1xf32>
    %c0_11 = arith.constant 0 : index
    %c0_12 = arith.constant 0 : index
    %23 = vector.load %arg6[%c0_11, %c0_12] : memref<8x1xf32, #tpu.memory_space<vmem>>, vector<8x1xf32>
    tpu.vector_store %arg6[%c0_11, %c0_12], %22 {strides = array<i32>} : memref<8x1xf32, #tpu.memory_space<vmem>>, vector<8x1xf32>,
    %c0_13 = arith.constant 0 : index
    %c0_14 = arith.constant 0 : index
    %24 = vector.load %arg5[%c0_13, %c0_14] : memref<8x1xf32, #tpu.memory_space<vmem>>, vector<8x1xf32>
    tpu.vector_store %arg5[%c0_13, %c0_14], %12 {strides = array<i32>} : memref<8x1xf32, #tpu.memory_space<vmem>>, vector<8x1xf32>,
    %c0_i32_15 = arith.constant 0 : i32
    %25 = arith.cmpi eq, %arg1, %c0_i32_15 : i32
    %26 = arith.extui %25 : i1 to i32
    %c0_i32_16 = arith.constant 0 : i32
    %27 = arith.cmpi ne, %26, %c0_i32_16 : i32
    scf.if %27 {
      %c0_17 = arith.constant 0 : index
      %c0_18 = arith.constant 0 : index
      %28 = vector.load %arg5[%c0_17, %c0_18] : memref<8x1xf32, #tpu.memory_space<vmem>>, vector<8x1xf32>
      %c0_19 = arith.constant 0 : index
      %c0_20 = arith.constant 0 : index
      %29 = vector.load %arg6[%c0_19, %c0_20] : memref<8x1xf32, #tpu.memory_space<vmem>>, vector<8x1xf32>
      %30 = math.log %29 : vector<8x1xf32>
      %31 = arith.addf %28, %30 : vector<8x1xf32>
      %32 = arith.subf %31, %2 : vector<8x1xf32>
      %c0_21 = arith.constant 0 : index
      %c0_22 = arith.constant 0 : index
      %33 = vector.load %arg4[%c0_21, %c0_22] : memref<8x1xf32, #tpu.memory_space<vmem>>, vector<8x1xf32>
      tpu.vector_store %arg4[%c0_21, %c0_22], %32 {strides = array<i32>} : memref<8x1xf32, #tpu.memory_space<vmem>>, vector<8x1xf32>,
    } else {
    }
    return
  }
  func.func @transform_0(%arg0: i32, %arg1: i32) -> (i32, i32) {
    %c0_i32 = arith.constant 0 : i32
    %c0_i32_0 = arith.constant 0 : i32
    return %arg0, %c0_i32 : i32, i32
  }
  func.func @transform_1(%arg0: i32, %arg1: i32) -> (i32, i32) {
    %c0_i32 = arith.constant 0 : i32
    return %arg0, %arg1 : i32, i32
  }
  func.func @transform_2(%arg0: i32, %arg1: i32) -> (i32, i32) {
    %c0_i32 = arith.constant 0 : i32
    %c0_i32_0 = arith.constant 0 : i32
    return %arg0, %c0_i32 : i32, i32
  }
}

</mosaic_0001>

<bundles_post_ra>
// kernel: tpu_custom_call.1
= control target key start
LH: loop header
LB: loop body
LE: loop exit
PB: predicated region body
PF: predicated region fallthrough
CT: control target
= control target key end

     0   :  { %7 = vsyncpa [#allocation5], 0  ;;  %s619_s0 = inlined_call_operand.vmem [shape: f32[16,1], index: 0, kind: input, shape index: {}]   ;;  %s620_s1 = inlined_call_operand.hbm [shape: f32[16,384], index: 1, kind: input, shape index: {}]   ;;  %s621_s2 = inlined_call_operand.vmem [shape: f32[16,1], index: 2, kind: output, shape index: {}]  }
   0x1   :  { %9 = vsyncpa [#allocation5 + $0x1], 0  ;;  %s522_s9 = smov 0   ;;  %s524_s10 = smov 0  }
   0x2   :  { %s526_s11 = smov 0   ;;  %s528_s12 = smov 0  }
   0x3   :  { %s530_s13 = smov 0   ;;  %s532_s14 = smov 0  }
   0x4 LB: > { %s342_s15 = sadd.s32 4294967295, %s503_s14   ;;  %s27_s16 = sadd.s32 1, %s499_s13  ;;  %s503_s14 = sphi %s532_s14, %s15_s14   ;;  %s499_s13 = sphi %s530_s13, %s627_s13   ;;  %s495_s12 = sphi %s528_s12, %s626_s12   ;;  %s491_s11 = sphi %s526_s11, %s625_s11   ;;  %s487_s10 = sphi %s524_s10, %s624_s10   ;;  %s483_s9 = sphi %s522_s9, %s623_s9  }
   0x5   : > { %p29_p0 = scmp.ge.s32.totalorder %s27_s16, 2  ;;  %s62_s17 = sadd.s32 1, %s491_s11 }
   0x6   : > { %p69_p1 = scmp.ne.s32.totalorder %s491_s11, %s487_s10  ;;  %p70_p2 = scmp.eq.s32.totalorder %s503_s14, 0 }
   0x7   : > { %s629_s16 = smov (%p29_p0, %s27_s16), 0  ;;  %p75_p4 = scmp.ne.s32.totalorder %s487_s10, %s483_s9 }
   0x8   : > { %p71_p3 = por %p70_p2, %p69_p1  ;;  %s57_s18 = ssub.s32 %s499_s13, %s629_s16 }
   0x9   : > { %p76_p5 = scmp.eq.s32.totalorder %s342_s15, 0  ;;  %p60_p6 = scmp.eq.s32.totalorder %s57_s18, 0 }
   0xa   : > { %p361_p8 = scmp.lt.s32.totalorder %s503_s14, 2  ;;  %s132_s21 = sand.u32 1, %s491_s11  }
   0xb   : > { %p561_p7 = por %p76_p5, %p75_p4  ;;  %s353_s22 = smul.u32 24, %s499_s13 }
   0xc   : > { %s567_s20 = scalar_select %p60_p6, %s491_s11, %s62_s17  }
   0xd   : > { %s352_s23 = smul.u32 24, %s132_s21  ;;  %s143_s26 = scalar_lea.hbm %s620_s1, %s353_s22 }
   0xe   : > { %p358_p9 = pnand %p361_p8, %p71_p3  ;;  %s145_s27 = sshll.u32 %s143_s26, 4  ;;  %s146_s27 = int_to_ptr.hbm [resolvable:$true] %s145_s27 }
   0xf   : > { %s136_s28 = scalar_lea.vmem [#allocation4], %s352_s23  ;;  %s133_s30 = scalar_lea.sflag [#allocation5], %s132_s21 }
  0x10   : > { %s147_s29 = sshll.u32 %s136_s28, 4  ;;  %p347_p10 = scmp.ge.s32.totalorder %s503_s14, 1  ;;  %s148_s29 = int_to_ptr.vmem [resolvable:$true] %s147_s29 }
  0x11   : > { %360 = dma.hbm_to_vmem [thread:$0]  (!%p358_p9), %s146_s27, 384, %s148_s29, %s133_s30  }
  0x12   : > { %p152_p11 = scmp.lt.s32.totalorder %s503_s14, 3 }
  0x14   : > { %p153_p12 = pnand %p347_p10, %p152_p11 }
  0x15   : > { %s158_s3 = sand.u32 (!%p153_p12), 1, %s487_s10  }
  0x16   : > { %156 = sbr.rel (%p153_p12) target bundleno = 424 (0x1a8), region = 28  ;;  %s159_s5 = scalar_lea.sflag (!%p153_p12), [#allocation5], %s158_s3 }
  0x17   : > { %s354_s4 = smul.u32 (!%p153_p12), 24, %s158_s3 }
  0x19   : > { %s162_s6 = scalar_lea.vmem (!%p153_p12), [#allocation4], %s354_s4 }
  0x1b   : > { %478 = dma.done.wait (%p561_p7), %s159_s5, 384  }
  0x1c   : > { %480 = vsyncadd (%p561_p7), %s159_s5, 4294966912  ;;  %v205_v0 = vld [vmem:[%s162_s6] sm:$0xff]  ;;  %v206_v1 = vld [vmem:[%s162_s6 + $0x8] sm:$0xff]  ;;  %p187_p13 = scmp.lt.s32.totalorder %s495_s12, 1  ;;  %vm202_vm0 = vcmask 7168   ;;  %v505_v10 = vmov 0  }
  0x1d   : > { %v207_v2 = vld [vmem:[%s162_s6 + $0x10] sm:$0xff]  ;;  %v208_v3 = vmul.f32 10.0, %v205_v0  ;;  %v209_v4 = vmul.f32 10.0, %v206_v1  ;;  %412 = vset.pattern.permute.xlu0 %v505_v10  ;;  %v506_v11 = vmov 1.0  }
  0x1e   : > { %v210_v5 = vmul.f32 10.0, %v207_v2  ;;  %s631_s12 = smov (!%p187_p13, %s495_s12), 1  ;;  %204 = vst.msk [vmem:[#allocation3] sm:$0xff] %vm202_vm0, %v506_v11 }
  0x1f   : > { %v212_v6 = vmax.f32 %v208_v3, %v209_v4  ;;  %s348_s7 = sshll.u32 %s631_s12, 3 }
  0x20   : > { %s190_s15 = scalar_lea.vmem %s619_s0, %s348_s7  ;;  %s195_s19 = scalar_lea.vmem %s621_s2, %s348_s7 }
  0x21   : > { %v213_v7 = vmax.f32 %v212_v6, %v210_v5  ;;  %v196_v8 = vld [vmem:[%s190_s15] sm:$0xff] }
  0x22   : > { %v197_v9 = vmul.f32 10.0, %v196_v8 }
  0x23   : > { %214 = vmax.xlane.f32.xlu0 %v213_v7 }
  0x24   : > { %203 = vst.msk [vmem:[#allocation2] sm:$0xff] %vm202_vm0, %v197_v9 }
  0x25   : > { %v217_v30 = vld [vmem:[#allocation3] sm:$0xff] }
  0x2b   : > { %v211_v12 = vld [vmem:[#allocation2] sm:$0xff] }
  0x96   : > { %v215_v13 = vpop.xlane.xlu0 %214 }
  0x97   : > { %v216_v14 = vmax.f32 %v211_v12, %v215_v13 }
  0x99   : > { %v218_v15 = vsub.f32 %v211_v12, %v216_v14  ;;  %243 = vst.msk [vmem:[#allocation2] sm:$0xff] %vm202_vm0, %v216_v14  ;;  %224 = vperm.xlu0 %412, %v216_v14  }
  0x9b   : > { %v219_v28 = vmul.f32 1.442695, %v218_v15 }
  0xa0   : > { %v247_v37 = vld [vmem:[#allocation2] sm:$0xff] }
 0x10b   : > { %v225_v16 = vpop.permute.xlu0 %224 }
 0x10c   : > { %v227_v17 = vsub.f32 %v208_v3, %v225_v16  ;;  %v228_v18 = vsub.f32 %v209_v4, %v225_v16  ;;  %v229_v19 = vsub.f32 %v210_v5, %v225_v16 }
 0x10e   : > { %v230_v20 = vmul.f32 1.442695, %v227_v17  ;;  %v232_v21 = vmul.f32 1.442695, %v228_v18  ;;  %v234_v22 = vmul.f32 1.442695, %v229_v19 }
 0x110   : > { %413 = vpow2.f32 %v230_v20 }
 0x111   : > { %415 = vpow2.f32 %v232_v21 }
 0x112   : > { %417 = vpow2.f32 %v234_v22 }
 0x113   : > { %419 = vpow2.f32 %v219_v28 }
 0x116   : > { %v414_v23 = vpop.eup %413 }
 0x117   : > { %v416_v24 = vpop.eup %415 }
 0x118   : > { %v236_v25 = vadd.f32 %v416_v24, %v414_v23  ;;  %v418_v26 = vpop.eup %417 }
 0x119   : > { %v420_v29 = vpop.eup %419 }
 0x11a   : > { %v237_v27 = vadd.f32 %v418_v26, %v236_v25  ;;  %v221_v31 = vmul.f32 %v420_v29, %v217_v30 }
 0x11c   : > { %238 = vadd.xlane.f32.xlu1 %v237_v27 }
 0x18f   : > { %v239_v32 = vpop.xlane.xlu1 %238 }
 0x190   : > { %v240_v33 = vadd.f32 %v239_v32, %v221_v31 }
 0x192   : > { %242 = vst.msk [vmem:[#allocation3] sm:$0xff] %vm202_vm0, %v240_v33 }
 0x199   : > { %v248_v34 = vld [vmem:[#allocation3] sm:$0xff] }
 0x19a   : > { %421 = vlog2.f32 %v248_v34 }
 0x1a0   : > { %v422_v35 = vpop.eup %421 }
 0x1a1   : > { %v250_v36 = vmul.f32 0.6931472, %v422_v35 }
 0x1a3   : > { %v251_v38 = vadd.f32 %v250_v36, %v247_v37 }
 0x1a5   : > { %v252_v39 = vsub.f32 %v251_v38, %v197_v9 }
 0x1a7   : > { %253 = vst.msk [vmem:[%s195_s19] sm:$0xff] %vm202_vm0, %v252_v39 }
 0x1a8 PF: > { %s15_s14 = sadd.s32 1, %s503_s14   ;;  %s623_s9 = smov %s487_s10 }
 0x1a9   : > { %p12_p0 = scmp.ge.s32.totalorder %s15_s14, 4   ;;  %s624_s10 = smov %s491_s11 }
 0x1aa   : > { %s625_s11 = smov %s567_s20  ;;  %s626_s12 = smov %s499_s13 }
 0x1ab   : > { %s627_s13 = smov %s629_s16  ;;  %14 = sbr.rel (!%p12_p0) target bundleno = 4 (0x4), region = 79 }
 0x1b0   :  { %273 = vsyncpa [#allocation5], 1 }
 0x1b1   :  { %275 = vsyncpa [#allocation5 + $0x1], 1 }

</bundles_post_ra>
